<compile_context>
chip_gen: v6e
topology: v6e:2x2x1
jax: 0.10.0
libtpu: 0.0.40
codegen_flags: <defaults>
</compile_context>

<pallas_src>
import jax
import jax.numpy as jnp
import numpy as np
from jax.experimental import pallas as pl
from jax.experimental.pallas import tpu as pltpu

BN_EPS = 1e-5
_LANE = 128


def _round_up(v, m):
    return ((v + m - 1) // m) * m


def _vmem_config():
    """(budget, vmem_limit) bytes, gated by TPU generation."""
    try:
        kind = jax.devices()[0].device_kind.lower()
    except Exception:
        kind = ""
    if "v5" in kind or "v6" in kind:               # 128 MiB physical VMEM
        return 48 * 1024 * 1024, 64 * 1024 * 1024
    return 20 * 1024 * 1024, 32 * 1024 * 1024      # v7x (64 MiB) / unknown: stay safe


def _pick_tiling(P, cin_p, cout_p, budget):
    """Exact-divisor row tiling (never pads P) -> (tm, n_tiles, ncore).

    Prefers an even tile count so phase 1 gets a 2-way "parallel" axis
    (both v7x TensorCores); otherwise falls back to a single-core split.
    tm is a multiple of 16 (bf16 packs 2 rows per sublane) when possible.
    """
    # Per-step working set: double-buffered bf16 x & y tiles + f32 out tile,
    # plus the resident (double-buffered) weight block.
    per_row = 2 * (4 * cin_p * 2) + 2 * (4 * cout_p * 2) + 2 * (cout_p * 4)
    resident = 2 * (cin_p * cout_p * 2) + 8 * (cout_p * 4)
    granule = 16 if P % 16 == 0 else (8 if P % 8 == 0 else None)
    if granule is None:
        # TODO(synk): P not a multiple of 8 -> single full-extent tile.
        return P, 1, 1
    tm_cap = max(granule, (budget - resident) // per_row)

    best_odd = None
    single = None
    for n in range(1, P // granule + 1):
        if P % n:
            continue
        tm = P // n
        if tm % granule or tm > tm_cap:
            continue
        if n % 2 == 0:
            return tm, n, 2                       # largest even-count tiling that fits
        if n == 1:
            single = (tm, 1, 1)
        elif best_odd is None:
            best_odd = (tm, n, 1)                 # largest odd (>1) fallback
    if best_odd is not None:
        return best_odd
    if single is not None:
        return single
    n = P // granule
    return granule, n, 2 if n % 2 == 0 else 1


def _stats_matmul_kernel(x_ref, w_ref, y_ref, mean_ref, m2_ref):
    """Phase 1: y = x @ w (MXU); write y (bf16); Welford-merge channel stats."""
    i = pl.program_id(1)

    @pl.when(i == 0)
    def _init():
        mean_ref[...] = jnp.zeros_like(mean_ref)
        m2_ref[...] = jnp.zeros_like(m2_ref)

    g, tm, cin = x_ref.shape
    cout = w_ref.shape[1]
    rows = g * tm
    x = x_ref[...].reshape(rows, cin)                       # leading-dim merge: free
    y = jnp.dot(x, w_ref[...], preferred_element_type=jnp.float32)
    y_ref[...] = y.reshape(g, tm, cout).astype(y_ref.dtype)

    # Per-tile mean / M2, merged into the running stats with Chan's formula
    # (numerically robust for large-mean activations vs E[y^2]-mean^2).
    tile_mean = jnp.sum(y, axis=0, keepdims=True) * (1.0 / rows)     # (1, cout)
    centered = y - tile_mean
    tile_m2 = jnp.sum(centered * centered, axis=0, keepdims=True)    # (1, cout)

    i_f = i.astype(jnp.float32)                   # rows seen so far = i_f * rows
    w_new = 1.0 / (i_f + 1.0)
    delta = tile_mean.reshape(1, 1, cout) - mean_ref[...]
    mean_ref[...] += delta * w_new
    m2_ref[...] += tile_m2.reshape(1, 1, cout) + (delta * delta) * (rows * i_f * w_new)


def _affine_pool_kernel(y_ref, scale_ref, shift_ref, o_ref):
    """Phase 2: BN affine (pool factor pre-folded) + ReLU + 2x2 avg-pool."""
    g, tm, cout = y_ref.shape
    y = y_ref[...].reshape(g * tm, cout).astype(jnp.float32)
    r = jnp.maximum(y * scale_ref[...] + shift_ref[...], 0.0)
    r = r.reshape(g, tm, cout)                              # leading-dim split: free
    o_ref[...] = r[0] + r[1] + r[2] + r[3]                  # 0.25 already folded in


@jax.jit
def transition_layer(x_nchw, weight, gamma, beta):
    """NCHW in, NCHW out — matches PyTorch TransitionLayer.forward (train-mode BN)."""
    N, Cin, H, W = x_nchw.shape
    Cout = weight.shape[0]
    Ho, Wo = H // 2, W // 2                                 # requires even H, W
    P = N * Ho * Wo

    cin_p = _round_up(Cin, _LANE)
    cout_p = _round_up(Cout, _LANE)
    budget, vmem_limit = _vmem_config()
    tm, n_tiles, ncore = _pick_tiling(P, cin_p, cout_p, budget)
    n_half = n_tiles // ncore

    # ---- layout glue: cast to bf16 FIRST, then one regroup transpose ----
    xg = x_nchw.astype(jnp.bfloat16).reshape(N, Cin, Ho, 2, Wo, 2)
    xg = jnp.transpose(xg, (3, 5, 0, 2, 4, 1)).reshape(4, P, Cin)
    if cin_p != Cin:                       # no-op for real DenseNet-169 shapes
        xg = jnp.pad(xg, ((0, 0), (0, 0), (0, cin_p - Cin)))

    wt = weight.reshape(Cout, Cin).T.astype(jnp.bfloat16)   # (Cin, Cout)
    if (cin_p, cout_p) != (Cin, Cout):
        wt = jnp.pad(wt, ((0, cin_p - Cin), (0, cout_p - Cout)))
    g2 = jnp.pad(gamma.astype(jnp.float32), (0, cout_p - Cout)).reshape(1, cout_p)
    b2 = jnp.pad(beta.astype(jnp.float32), (0, cout_p - Cout)).reshape(1, cout_p)

    x_spec = pl.BlockSpec((4, tm, cin_p), lambda c, i: (0, c * n_half + i, 0))
    w_spec = pl.BlockSpec((cin_p, cout_p), lambda c, i: (0, 0))        # resident
    y_out_spec = pl.BlockSpec((4, tm, cout_p), lambda c, i: (0, c * n_half + i, 0))
    stat_spec = pl.BlockSpec((1, 1, cout_p), lambda c, i: (c, 0, 0))   # per-core acc

    # ---- phase 1: conv-as-matmul, y -> HBM (bf16), Welford channel stats ----
    y_all, mean_parts, m2_parts = pl.pallas_call(
        _stats_matmul_kernel,
        out_shape=(jax.ShapeDtypeStruct((4, P, cout_p), jnp.bfloat16),
                   jax.ShapeDtypeStruct((ncore, 1, cout_p), jnp.float32),
                   jax.ShapeDtypeStruct((ncore, 1, cout_p), jnp.float32)),
        grid=(ncore, n_half),
        in_specs=[x_spec, w_spec],
        out_specs=(y_out_spec, stat_spec, stat_spec),
        compiler_params=pltpu.CompilerParams(
            dimension_semantics=("parallel", "arbitrary"),
            vmem_limit_bytes=vmem_limit),
    )(xg, wt)

    # ---- merge per-core partials; fold BN (biased var) + 0.25 pool factor ----
    if ncore == 1:
        mean = mean_parts[0]                                # (1, cout_p)
        m2 = m2_parts[0]
    else:
        rows_per_core = jnp.float32(4 * tm * n_half)
        m_a, m_b = mean_parts[0], mean_parts[1]
        delta = m_b - m_a
        mean = 0.5 * (m_a + m_b)
        m2 = m2_parts[0] + m2_parts[1] + delta * delta * (0.5 * rows_per_core)
    count = jnp.float32(4 * P)                              # == N * H * W
    var = jnp.maximum(m2 / count, 0.0)
    scale = g2 * jax.lax.rsqrt(var + BN_EPS)
    shift = b2 - mean * scale
    scale4 = 0.25 * scale               # fold AvgPool2d(2) factor into the affine
    shift4 = 0.25 * shift               # (ReLU is positively homogeneous)

    # ---- phase 2: affine + ReLU + 2x2 avg-pool; no second matmul ----
    out = pl.pallas_call(
        _affine_pool_kernel,
        out_shape=jax.ShapeDtypeStruct((P, cout_p), jnp.float32),
        grid=(n_tiles,),
        in_specs=[pl.BlockSpec((4, tm, cout_p), lambda i: (0, i, 0)),
                  pl.BlockSpec((1, cout_p), lambda i: (0, 0)),
                  pl.BlockSpec((1, cout_p), lambda i: (0, 0))],
        out_specs=pl.BlockSpec((tm, cout_p), lambda i: (i, 0)),
        compiler_params=pltpu.CompilerParams(
            dimension_semantics=("parallel",),
            vmem_limit_bytes=vmem_limit),
    )(y_all, scale4, shift4)

    if cout_p != Cout:
        out = out[:, :Cout]
    out = out.reshape(N, Ho, Wo, Cout)
    # TODO(synk): an NHWC-consuming downstream would remove this transpose.
    return jnp.transpose(out, (0, 3, 1, 2))                 # NCHW


def reference(x_nchw, weight, gamma, beta):
    """Pure-JAX f32 reference mirroring the PyTorch forward (training-mode BN)."""
    y = jax.lax.conv_general_dilated(
        x_nchw, weight, window_strides=(1, 1), padding="VALID",
        dimension_numbers=("NCHW", "OIHW", "NCHW"))
    mean = y.mean(axis=(0, 2, 3), keepdims=True)
    var = ((y - mean) ** 2).mean(axis=(0, 2, 3), keepdims=True)
    yn = (y - mean) * jax.lax.rsqrt(var + BN_EPS)
    yn = yn * gamma.reshape(1, -1, 1, 1) + beta.reshape(1, -1, 1, 1)
    r = jnp.maximum(yn, 0.0)
    N, C, H, W = r.shape
    return r.reshape(N, C, H // 2, 2, W // 2, 2).mean(axis=(3, 5))


if __name__ == "__main__":
    key = jax.random.PRNGKey(0)
    k_x, k_w = jax.random.split(key)

    N, Cin, Cout, H, W = 2, 8, 4, 16, 16

    x = jax.random.normal(k_x, (N, Cin, H, W), dtype=jnp.float32)

    # Conv2d(8, 4, kernel_size=1, bias=False), xavier_uniform_ with relu gain.
    gain = float(np.sqrt(2.0))                          # calculate_gain('relu')
    fan_in, fan_out = Cin * 1 * 1, Cout * 1 * 1
    bound = gain * float(np.sqrt(6.0 / (fan_in + fan_out)))
    weight = jax.random.uniform(
        k_w, (Cout, Cin, 1, 1), dtype=jnp.float32, minval=-bound, maxval=bound)

    # BatchNorm2d(4) default init: weight=1, bias=0.
    gamma = jnp.ones((Cout,), dtype=jnp.float32)
    beta = jnp.zeros((Cout,), dtype=jnp.float32)
    # TODO(synk): BN running_mean/running_var buffer updates (training-mode side
    # effects) are not reproduced; they do not affect the forward output.

    out = transition_layer(x, weight, gamma, beta)
    out = jax.block_until_ready(out)

    ref = reference(x, weight, gamma, beta)
    assert out.shape == (N, Cout, H // 2, W // 2), out.shape
    # Tolerance reflects the bf16 MXU / bf16-materialized-y datapath vs f32 ref.
    np.testing.assert_allclose(np.asarray(out), np.asarray(ref),
                               rtol=5e-2, atol=5e-2)
    print("KERNEL_OK")
</pallas_src>

<mosaic_0001>
module attributes {stable_mosaic.version = 11 : i64} {
  func.func @_stats_matmul_kernel(%arg0: i32, %arg1: i32, %arg2: memref<4x64x128xbf16, #tpu.memory_space<vmem>>, %arg3: memref<128x128xbf16, #tpu.memory_space<vmem>>, %arg4: memref<4x64x128xbf16, #tpu.memory_space<vmem>>, %arg5: memref<1x1x128xf32, #tpu.memory_space<vmem>>, %arg6: memref<1x1x128xf32, #tpu.memory_space<vmem>>) attributes {dimension_semantics = [#tpu.dimension_semantics<parallel>, #tpu.dimension_semantics<arbitrary>], iteration_bounds = array<i64: 2, 1>, scalar_prefetch = 0 : i64, scratch_operands = 0 : i64, tpu.core_type = #tpu.core_type<tc>, window_params = [{transform_indices = @transform_0, window_bounds = array<i64: 4, 64, 128>}, {pipeline_mode = #tpu.pipeline_mode<synchronous>, transform_indices = @transform_1, window_bounds = array<i64: 128, 128>}, {transform_indices = @transform_2, window_bounds = array<i64: 4, 64, 128>}, {transform_indices = @transform_3, window_bounds = array<i64: 1, 1, 128>}, {transform_indices = @transform_4, window_bounds = array<i64: 1, 1, 128>}]} {
    %c0_i32 = arith.constant 0 : i32
    %0 = arith.cmpi eq, %arg1, %c0_i32 : i32
    %1 = arith.extui %0 : i1 to i32
    %c0_i32_0 = arith.constant 0 : i32
    %2 = arith.cmpi ne, %1, %c0_i32_0 : i32
    scf.if %2 {
      %cst_29 = arith.constant 0.000000e+00 : f32
      %40 = vector.broadcast %cst_29 : f32 to vector<1x1x128xf32>
      %c0_30 = arith.constant 0 : index
      %c0_31 = arith.constant 0 : index
      %c0_32 = arith.constant 0 : index
      %41 = vector.load %arg5[%c0_30, %c0_31, %c0_32] : memref<1x1x128xf32, #tpu.memory_space<vmem>>, vector<1x1x128xf32>
      tpu.vector_store %arg5[%c0_30, %c0_31, %c0_32], %40 {strides = array<i32>} : memref<1x1x128xf32, #tpu.memory_space<vmem>>, vector<1x1x128xf32>,
      %cst_33 = arith.constant 0.000000e+00 : f32
      %42 = vector.broadcast %cst_33 : f32 to vector<1x1x128xf32>
      %c0_34 = arith.constant 0 : index
      %c0_35 = arith.constant 0 : index
      %c0_36 = arith.constant 0 : index
      %43 = vector.load %arg6[%c0_34, %c0_35, %c0_36] : memref<1x1x128xf32, #tpu.memory_space<vmem>>, vector<1x1x128xf32>
      tpu.vector_store %arg6[%c0_34, %c0_35, %c0_36], %42 {strides = array<i32>} : memref<1x1x128xf32, #tpu.memory_space<vmem>>, vector<1x1x128xf32>,
    } else {
    }
    %c0 = arith.constant 0 : index
    %c0_1 = arith.constant 0 : index
    %c0_2 = arith.constant 0 : index
    %3 = vector.load %arg2[%c0, %c0_1, %c0_2] : memref<4x64x128xbf16, #tpu.memory_space<vmem>>, vector<4x64x128xbf16>
    %4 = vector.shape_cast %3 : vector<4x64x128xbf16> to vector<256x128xbf16>
    %c0_3 = arith.constant 0 : index
    %c0_4 = arith.constant 0 : index
    %5 = vector.load %arg3[%c0_3, %c0_4] : memref<128x128xbf16, #tpu.memory_space<vmem>>, vector<128x128xbf16>
    %cst = arith.constant dense<0.000000e+00> : vector<256x128xf32>
    %6 = tpu.matmul %4, %5, %cst {dimension_numbers = #tpu.dot_dimension_numbers<[1], [0], [0], [1], [0, 0, 1, 1], [], []>} : vector<256x128xbf16>, vector<128x128xbf16>, vector<256x128xf32> -> vector<256x128xf32>
    %7 = vector.shape_cast %6 : vector<256x128xf32> to vector<4x64x128xf32>
    %8 = arith.truncf %7 : vector<4x64x128xf32> to vector<4x64x128xbf16>
    %c0_5 = arith.constant 0 : index
    %c0_6 = arith.constant 0 : index
    %c0_7 = arith.constant 0 : index
    %9 = vector.load %arg4[%c0_5, %c0_6, %c0_7] : memref<4x64x128xbf16, #tpu.memory_space<vmem>>, vector<4x64x128xbf16>
    tpu.vector_store %arg4[%c0_5, %c0_6, %c0_7], %8 {strides = array<i32>} : memref<4x64x128xbf16, #tpu.memory_space<vmem>>, vector<4x64x128xbf16>,
    %cst_8 = arith.constant dense<0.000000e+00> : vector<128xf32>
    %10 = vector.multi_reduction <add>, %6, %cst_8 [0] : vector<256x128xf32> to vector<128xf32>
    %11 = vector.shape_cast %10 : vector<128xf32> to vector<1x128xf32>
    %cst_9 = arith.constant 3.906250e-03 : f32
    %12 = vector.broadcast %cst_9 : f32 to vector<1x128xf32>
    %13 = arith.mulf %11, %12 : vector<1x128xf32>
    %14 = vector.broadcast %13 : vector<1x128xf32> to vector<256x128xf32>
    %15 = arith.subf %6, %14 : vector<256x128xf32>
    %16 = arith.mulf %15, %15 : vector<256x128xf32>
    %cst_10 = arith.constant dense<0.000000e+00> : vector<128xf32>
    %17 = vector.multi_reduction <add>, %16, %cst_10 [0] : vector<256x128xf32> to vector<128xf32>
    %18 = vector.shape_cast %17 : vector<128xf32> to vector<1x128xf32>
    %19 = arith.sitofp %arg1 : i32 to f32
    %cst_11 = arith.constant 1.000000e+00 : f32
    %20 = arith.addf %19, %cst_11 : f32
    %cst_12 = arith.constant 1.000000e+00 : f32
    %21 = arith.divf %cst_12, %20 : f32
    %22 = vector.shape_cast %13 : vector<1x128xf32> to vector<1x1x128xf32>
    %c0_13 = arith.constant 0 : index
    %c0_14 = arith.constant 0 : index
    %c0_15 = arith.constant 0 : index
    %23 = vector.load %arg5[%c0_13, %c0_14, %c0_15] : memref<1x1x128xf32, #tpu.memory_space<vmem>>, vector<1x1x128xf32>
    %24 = arith.subf %22, %23 : vector<1x1x128xf32>
    %c0_16 = arith.constant 0 : index
    %c0_17 = arith.constant 0 : index
    %c0_18 = arith.constant 0 : index
    %25 = vector.load %arg5[%c0_16, %c0_17, %c0_18] : memref<1x1x128xf32, #tpu.memory_space<vmem>>, vector<1x1x128xf32>
    %26 = vector.broadcast %21 : f32 to vector<1x1x128xf32>
    %27 = arith.mulf %24, %26 : vector<1x1x128xf32>
    %28 = arith.addf %25, %27 : vector<1x1x128xf32>
    %c0_19 = arith.constant 0 : index
    %c0_20 = arith.constant 0 : index
    %c0_21 = arith.constant 0 : index
    %29 = vector.load %arg5[%c0_19, %c0_20, %c0_21] : memref<1x1x128xf32, #tpu.memory_space<vmem>>, vector<1x1x128xf32>
    tpu.vector_store %arg5[%c0_19, %c0_20, %c0_21], %28 {strides = array<i32>} : memref<1x1x128xf32, #tpu.memory_space<vmem>>, vector<1x1x128xf32>,
    %c0_22 = arith.constant 0 : index
    %c0_23 = arith.constant 0 : index
    %c0_24 = arith.constant 0 : index
    %30 = vector.load %arg6[%c0_22, %c0_23, %c0_24] : memref<1x1x128xf32, #tpu.memory_space<vmem>>, vector<1x1x128xf32>
    %31 = vector.shape_cast %18 : vector<1x128xf32> to vector<1x1x128xf32>
    %32 = arith.mulf %24, %24 : vector<1x1x128xf32>
    %cst_25 = arith.constant 2.560000e+02 : f32
    %33 = arith.mulf %cst_25, %19 : f32
    %34 = arith.mulf %33, %21 : f32
    %35 = vector.broadcast %34 : f32 to vector<1x1x128xf32>
    %36 = arith.mulf %32, %35 : vector<1x1x128xf32>
    %37 = arith.addf %31, %36 : vector<1x1x128xf32>
    %38 = arith.addf %30, %37 : vector<1x1x128xf32>
    %c0_26 = arith.constant 0 : index
    %c0_27 = arith.constant 0 : index
    %c0_28 = arith.constant 0 : index
    %39 = vector.load %arg6[%c0_26, %c0_27, %c0_28] : memref<1x1x128xf32, #tpu.memory_space<vmem>>, vector<1x1x128xf32>
    tpu.vector_store %arg6[%c0_26, %c0_27, %c0_28], %38 {strides = array<i32>} : memref<1x1x128xf32, #tpu.memory_space<vmem>>, vector<1x1x128xf32>,
    return
  }
  func.func @transform_0(%arg0: i32, %arg1: i32) -> (i32, i32, i32) {
    %c1_i32 = arith.constant 1 : i32
    %0 = arith.muli %arg0, %c1_i32 : i32
    %1 = arith.addi %0, %arg1 : i32
    %c0_i32 = arith.constant 0 : i32
    %c0_i32_0 = arith.constant 0 : i32
    %c0_i32_1 = arith.constant 0 : i32
    return %c0_i32, %1, %c0_i32_0 : i32, i32, i32
  }
  func.func @transform_1(%arg0: i32, %arg1: i32) -> (i32, i32) {
    %c0_i32 = arith.constant 0 : i32
    %c0_i32_0 = arith.constant 0 : i32
    %c0_i32_1 = arith.constant 0 : i32
    return %c0_i32, %c0_i32_0 : i32, i32
  }
  func.func @transform_2(%arg0: i32, %arg1: i32) -> (i32, i32, i32) {
    %c1_i32 = arith.constant 1 : i32
    %0 = arith.muli %arg0, %c1_i32 : i32
    %1 = arith.addi %0, %arg1 : i32
    %c0_i32 = arith.constant 0 : i32
    %c0_i32_0 = arith.constant 0 : i32
    %c0_i32_1 = arith.constant 0 : i32
    return %c0_i32, %1, %c0_i32_0 : i32, i32, i32
  }
  func.func @transform_3(%arg0: i32, %arg1: i32) -> (i32, i32, i32) {
    %c0_i32 = arith.constant 0 : i32
    %c0_i32_0 = arith.constant 0 : i32
    %c0_i32_1 = arith.constant 0 : i32
    return %arg0, %c0_i32, %c0_i32_0 : i32, i32, i32
  }
  func.func @transform_4(%arg0: i32, %arg1: i32) -> (i32, i32, i32) {
    %c0_i32 = arith.constant 0 : i32
    %c0_i32_0 = arith.constant 0 : i32
    %c0_i32_1 = arith.constant 0 : i32
    return %arg0, %c0_i32, %c0_i32_0 : i32, i32, i32
  }
}

module attributes {stable_mosaic.version = 11 : i64} {
  func.func @_affine_pool_kernel(%arg0: i32, %arg1: memref<4x64x128xbf16, #tpu.memory_space<vmem>>, %arg2: memref<1x128xf32, #tpu.memory_space<vmem>>, %arg3: memref<1x128xf32, #tpu.memory_space<vmem>>, %arg4: memref<64x128xf32, #tpu.memory_space<vmem>>) attributes {dimension_semantics = [#tpu.dimension_semantics<parallel>], iteration_bounds = array<i64: 2>, scalar_prefetch = 0 : i64, scratch_operands = 0 : i64, tpu.core_type = #tpu.core_type<tc>, window_params = [{transform_indices = @transform_0, window_bounds = array<i64: 4, 64, 128>}, {pipeline_mode = #tpu.pipeline_mode<synchronous>, transform_indices = @transform_1, window_bounds = array<i64: 1, 128>}, {pipeline_mode = #tpu.pipeline_mode<synchronous>, transform_indices = @transform_2, window_bounds = array<i64: 1, 128>}, {transform_indices = @transform_3, window_bounds = array<i64: 64, 128>}]} {
    %c0 = arith.constant 0 : index
    %c0_0 = arith.constant 0 : index
    %c0_1 = arith.constant 0 : index
    %0 = vector.load %arg1[%c0, %c0_0, %c0_1] : memref<4x64x128xbf16, #tpu.memory_space<vmem>>, vector<4x64x128xbf16>
    %1 = vector.shape_cast %0 : vector<4x64x128xbf16> to vector<256x128xbf16>
    %2 = arith.extf %1 : vector<256x128xbf16> to vector<256x128xf32>
    %c0_2 = arith.constant 0 : index
    %c0_3 = arith.constant 0 : index
    %3 = vector.load %arg2[%c0_2, %c0_3] : memref<1x128xf32, #tpu.memory_space<vmem>>, vector<1x128xf32>
    %4 = vector.broadcast %3 : vector<1x128xf32> to vector<256x128xf32>
    %5 = arith.mulf %2, %4 : vector<256x128xf32>
    %c0_4 = arith.constant 0 : index
    %c0_5 = arith.constant 0 : index
    %6 = vector.load %arg3[%c0_4, %c0_5] : memref<1x128xf32, #tpu.memory_space<vmem>>, vector<1x128xf32>
    %7 = vector.broadcast %6 : vector<1x128xf32> to vector<256x128xf32>
    %8 = arith.addf %5, %7 : vector<256x128xf32>
    %cst = arith.constant 0.000000e+00 : f32
    %9 = vector.broadcast %cst : f32 to vector<256x128xf32>
    %10 = arith.maximumf %8, %9 : vector<256x128xf32>
    %11 = vector.shape_cast %10 : vector<256x128xf32> to vector<4x64x128xf32>
    %12 = vector.extract_strided_slice %11 {offsets = [0, 0, 0], sizes = [1, 64, 128], strides = [1, 1, 1]} : vector<4x64x128xf32> to vector<1x64x128xf32>
    %13 = vector.shape_cast %12 : vector<1x64x128xf32> to vector<64x128xf32>
    %14 = vector.extract_strided_slice %11 {offsets = [1, 0, 0], sizes = [1, 64, 128], strides = [1, 1, 1]} : vector<4x64x128xf32> to vector<1x64x128xf32>
    %15 = vector.shape_cast %14 : vector<1x64x128xf32> to vector<64x128xf32>
    %16 = arith.addf %13, %15 : vector<64x128xf32>
    %17 = vector.extract_strided_slice %11 {offsets = [2, 0, 0], sizes = [1, 64, 128], strides = [1, 1, 1]} : vector<4x64x128xf32> to vector<1x64x128xf32>
    %18 = vector.shape_cast %17 : vector<1x64x128xf32> to vector<64x128xf32>
    %19 = arith.addf %16, %18 : vector<64x128xf32>
    %20 = vector.extract_strided_slice %11 {offsets = [3, 0, 0], sizes = [1, 64, 128], strides = [1, 1, 1]} : vector<4x64x128xf32> to vector<1x64x128xf32>
    %21 = vector.shape_cast %20 : vector<1x64x128xf32> to vector<64x128xf32>
    %22 = arith.addf %19, %21 : vector<64x128xf32>
    %c0_6 = arith.constant 0 : index
    %c0_7 = arith.constant 0 : index
    %23 = vector.load %arg4[%c0_6, %c0_7] : memref<64x128xf32, #tpu.memory_space<vmem>>, vector<64x128xf32>
    tpu.vector_store %arg4[%c0_6, %c0_7], %22 {strides = array<i32>} : memref<64x128xf32, #tpu.memory_space<vmem>>, vector<64x128xf32>,
    return
  }
  func.func @transform_0(%arg0: i32) -> (i32, i32, i32) {
    %c0_i32 = arith.constant 0 : i32
    %c0_i32_0 = arith.constant 0 : i32
    %c0_i32_1 = arith.constant 0 : i32
    return %c0_i32, %arg0, %c0_i32_0 : i32, i32, i32
  }
  func.func @transform_1(%arg0: i32) -> (i32, i32) {
    %c0_i32 = arith.constant 0 : i32
    %c0_i32_0 = arith.constant 0 : i32
    %c0_i32_1 = arith.constant 0 : i32
    return %c0_i32, %c0_i32_0 : i32, i32
  }
  func.func @transform_2(%arg0: i32) -> (i32, i32) {
    %c0_i32 = arith.constant 0 : i32
    %c0_i32_0 = arith.constant 0 : i32
    %c0_i32_1 = arith.constant 0 : i32
    return %c0_i32, %c0_i32_0 : i32, i32
  }
  func.func @transform_3(%arg0: i32) -> (i32, i32) {
    %c0_i32 = arith.constant 0 : i32
    %c0_i32_0 = arith.constant 0 : i32
    return %arg0, %c0_i32 : i32, i32
  }
}

</mosaic_0001>

<bundles_post_ra>
// kernel: transition_layer.2
= control target key start
LH: loop header
LB: loop body
LE: loop exit
PB: predicated region body
PF: predicated region fallthrough
CT: control target
= control target key end

     0   :  { %s1789_s15 = smov 0   ;;  %s1791_s16 = smov 0   ;;  %s2177_s0 = inlined_call_operand.vmem [shape: bf16[4,128,128], index: 0, kind: input, shape index: {}]   ;;  %s2178_s1 = inlined_call_operand.vmem [shape: bf16[128,128], index: 1, kind: input, shape index: {}]   ;;  %s2179_s2 = inlined_call_operand.vmem [shape: bf16[4,128,128], index: 2, kind: output, shape index: {0}]   ;;  %s2180_s3 = inlined_call_operand.vmem [shape: f32[2,1,128], index: 3, kind: output, shape index: {1}]   ;;  %s2181_s4 = inlined_call_operand.vmem [shape: f32[2,1,128], index: 4, kind: output, shape index: {2}]  }
   0x1   :  { %s1793_s17 = smov 0   ;;  %s1795_s18 = smov 0  }
   0x2   :  { %s1797_s19 = smov 0  }
   0x3 LB: > { %s27_s20 = sadd.s32 1, %s1757_s18  ;;  %s1370_s21 = sadd.s32 4294967295, %s1761_s19   ;;  %s1761_s19 = sphi %s1797_s19, %s15_s19   ;;  %s1757_s18 = sphi %s1795_s18, %s2186_s18   ;;  %s1753_s17 = sphi %s1793_s17, %s2185_s17   ;;  %s1749_s16 = sphi %s1791_s16, %s2184_s16   ;;  %s1745_s15 = sphi %s1789_s15, %s2183_s15  }
   0x4   : > { %p29_p0 = scmp.ge.s32.totalorder %s27_s20, 2  ;;  %p43_p1 = scmp.ne.s32.totalorder %s1749_s16, %s1745_s15 }
   0x5   : > { %p44_p2 = scmp.eq.s32.totalorder %s1761_s19, 0  ;;  %p96_p4 = scmp.eq.s32.totalorder %s1370_s21, 1 }
   0x6   : > { %s2188_s20 = smov (%p29_p0, %s27_s20), 0  ;;  %s36_s23 = sadd.s32 1, %s1749_s16 }
   0x7   : > { %p45_p3 = por %p44_p2, %p43_p1  ;;  %s33_s22 = ssub.s32 %s1757_s18, %s2188_s20 }
   0x8   : > { %p34_p5 = scmp.eq.s32.totalorder %s33_s22, 0  ;;  %p1824_p6 = por %p96_p4, %p43_p1 }
   0x9   : > { %p1373_p7 = scmp.ge.s32.totalorder %s1761_s19, 2 }
   0xa   : > { %s1829_s25 = scalar_select %p34_p5, %s1749_s16, %s36_s23  }
   0xb   : > { %173 = sbr.rel (%p1373_p7) target bundleno = 28 (0x1c), region = 20 }
  0x10   : > { %176 = sbr.rel (!%p45_p3) target bundleno = 28 (0x1c), region = 24  ;;  %s178_s26 = sand.u32 (%p45_p3), 1, %s1749_s16  }
  0x11   : > { %s1441_s27 = sshll.u32 (%p45_p3), %s1757_s18, 5  ;;  %s1374_s28 = sshll.u32 (%p45_p3), %s178_s26, 7 }
  0x12   : > { %s1837_s5 = scalar_lea.vmem (%p45_p3), %s2177_s0, %s1441_s27  ;;  %s180_s6 = scalar_lea.vmem (%p45_p3), [#allocation2], %s1374_s28 }
  0x13   : > { %v201_v0 = vld [vmem:[%s1837_s5] sm:$0xff] (%p45_p3)   ;;  %v205_v1 = vld [vmem:[%s1837_s5 + $0x8] sm:$0xff] (%p45_p3)   ;;  %v209_v2 = vld [vmem:[%s1837_s5 + $0x10] sm:$0xff] (%p45_p3)  }
  0x14   : > { %202 = vst [vmem:[%s180_s6] sm:$0xff] (%p45_p3), %v201_v0   ;;  %206 = vst [vmem:[%s180_s6 + $0x8] sm:$0xff] (%p45_p3), %v205_v1   ;;  %v213_v3 = vld [vmem:[%s1837_s5 + $0x18] sm:$0xff] (%p45_p3)   ;;  %v217_v4 = vld [vmem:[%s1837_s5 + $0x40] sm:$0xff] (%p45_p3)  }
  0x15   : > { %210 = vst [vmem:[%s180_s6 + $0x10] sm:$0xff] %v209_v2   ;;  %v221_v5 = vld [vmem:[%s1837_s5 + $0x48] sm:$0xff]   ;;  %214 = vst [vmem:[%s180_s6 + $0x18] sm:$0xff] %v213_v3   ;;  %v225_v6 = vld [vmem:[%s1837_s5 + $0x50] sm:$0xff]  }
  0x16   : > { %218 = vst [vmem:[%s180_s6 + $0x20] sm:$0xff] %v217_v4   ;;  %222 = vst [vmem:[%s180_s6 + $0x28] sm:$0xff] %v221_v5   ;;  %v229_v7 = vld [vmem:[%s1837_s5 + $0x58] sm:$0xff]   ;;  %v233_v8 = vld [vmem:[%s1837_s5 + $0x80] sm:$0xff]  }
  0x17   : > { %226 = vst [vmem:[%s180_s6 + $0x30] sm:$0xff] %v225_v6   ;;  %230 = vst [vmem:[%s180_s6 + $0x38] sm:$0xff] %v229_v7   ;;  %v237_v9 = vld [vmem:[%s1837_s5 + $0x88] sm:$0xff]   ;;  %v241_v10 = vld [vmem:[%s1837_s5 + $0x90] sm:$0xff]  }
  0x18   : > { %234 = vst [vmem:[%s180_s6 + $0x40] sm:$0xff] %v233_v8   ;;  %v245_v11 = vld [vmem:[%s1837_s5 + $0x98] sm:$0xff]   ;;  %238 = vst [vmem:[%s180_s6 + $0x48] sm:$0xff] %v237_v9   ;;  %v249_v12 = vld [vmem:[%s1837_s5 + $0xc0] sm:$0xff]  }
  0x19   : > { %242 = vst [vmem:[%s180_s6 + $0x50] sm:$0xff] %v241_v10   ;;  %246 = vst [vmem:[%s180_s6 + $0x58] sm:$0xff] %v245_v11   ;;  %v253_v13 = vld [vmem:[%s1837_s5 + $0xc8] sm:$0xff]   ;;  %v257_v14 = vld [vmem:[%s1837_s5 + $0xd0] sm:$0xff]  }
  0x1a   : > { %250 = vst [vmem:[%s180_s6 + $0x60] sm:$0xff] %v249_v12   ;;  %254 = vst [vmem:[%s180_s6 + $0x68] sm:$0xff] %v253_v13   ;;  %v261_v15 = vld [vmem:[%s1837_s5 + $0xd8] sm:$0xff]  }
  0x1b   : > { %258 = vst [vmem:[%s180_s6 + $0x70] sm:$0xff] %v257_v14   ;;  %262 = vst [vmem:[%s180_s6 + $0x78] sm:$0xff] %v261_v15  }
  0x1c PF: > { %p1377_p8 = scmp.ge.s32.totalorder %s1761_s19, 1  ;;  %p351_p9 = scmp.lt.s32.totalorder %s1761_s19, 3 }
  0x1e   : > { %p352_p10 = pnand %p1377_p8, %p351_p9 }
  0x1f   : > { %s358_s9 = sand.u32 (!%p352_p10), 1, %s1745_s15   ;;  %p392_p11 = scmp.lt.s32.totalorder (!%p352_p10), %s1753_s17, 1 }
  0x20   : > { %355 = sbr.rel (%p352_p10) target bundleno = 428 (0x1ac), region = 65  ;;  %s1864_s12 = sshll.u32 (!%p352_p10), %s358_s9, 7 }
  0x21   : > { %s1873_s22 = scalar_lea.vmem (!%p352_p10), [#allocation2], %s1864_s12  ;;  %s1938_s21 = scalar_lea.vmem (!%p352_p10), [#allocation3], %s1864_s12 }
  0x25   : > { %v1699_v16 = vld [vmem:[%s2178_s1 + $0x38] sm:$0xff]   ;;  %v1700_v17 = vld [vmem:[%s2178_s1 + $0x30] sm:$0xff]   ;;  %v1701_v18 = vld [vmem:[%s2178_s1 + $0x28] sm:$0xff]   ;;  %s393_s7 = scalar_select %p392_p11, %s1753_s17, 1  ;;  %v1763_v40 = vmov 0.0  }
  0x26   : > { %1594 = vmatprep.subr.bf16.mxu0 %v1699_v16  ;;  %1642 = vmatprep.subr.bf16.mxu1 %v1699_v16  ;;  %v1702_v19 = vld [vmem:[%s2178_s1 + $0x20] sm:$0xff]   ;;  %v1703_v21 = vld [vmem:[%s2178_s1 + $0x18] sm:$0xff]   ;;  %v1704_v22 = vld [vmem:[%s2178_s1 + $0x10] sm:$0xff]   ;;  %s1474_s12 = sshll.u32 (%p1824_p6), %s1753_s17, 5 }
  0x27   : > { %1595 = vmatpush3.bf16.msra.mxu0 %v1699_v16  ;;  %1650 = vmatpush3.bf16.msra.mxu1 %v1699_v16  ;;  %v1707_v20 = vld [vmem:[%s1873_s22] sm:$0xff]   ;;  %v1705_v24 = vld [vmem:[%s2178_s1 + $0x8] sm:$0xff]   ;;  %v1709_v28 = vld [vmem:[%s1873_s22 + $0x10] sm:$0xff]   ;;  %s1908_s10 = scalar_lea.vmem %s2180_s3, %s393_s7  ;;  %s1913_s14 = scalar_lea.vmem %s2181_s4, %s393_s7 }
  0x28   : > { %1596 = vmatprep.subr.bf16.mxu0 %v1700_v17  ;;  %1643 = vmatprep.subr.bf16.mxu1 %v1700_v17  ;;  %v1715_v23 = vld [vmem:[%s1873_s22 + $0x40] sm:$0xff]   ;;  %v1708_v26 = vld [vmem:[%s1873_s22 + $0x8] sm:$0xff]   ;;  %v1717_v29 = vld [vmem:[%s1873_s22 + $0x50] sm:$0xff]   ;;  %403 = vst [vmem:[%s1908_s10] sm:$0x1] %v1763_v40  ;;  %s1093_s23 = scalar_lea.vmem (%p1824_p6), %s2179_s2, %s1474_s12 }
  0x29   : > { %1610 = vmatprep.mubr.bf16.mxu0 %v1707_v20  ;;  %1626 = vmatprep.mubr.bf16.mxu1 %v1715_v23  ;;  %v1706_v25 = vld [vmem:[%s2178_s1] sm:$0xff]   ;;  %v1716_v27 = vld [vmem:[%s1873_s22 + $0x48] sm:$0xff]   ;;  %v1710_v30 = vld [vmem:[%s1873_s22 + $0x18] sm:$0xff]   ;;  %404 = vst [vmem:[%s1913_s14] sm:$0x1] %v1763_v40 }
  0x2a   : > { %v1718_v31 = vld [vmem:[%s1873_s22 + $0x58] sm:$0xff]   ;;  %v1711_v32 = vld [vmem:[%s1873_s22 + $0x20] sm:$0xff]   ;;  %v1712_v34 = vld [vmem:[%s1873_s22 + $0x28] sm:$0xff]  }
  0x2b   : > { %1597 = vmatpush3.bf16.msra.mxu0 %v1700_v17  ;;  %1651 = vmatpush3.bf16.msra.mxu1 %v1700_v17  ;;  %v1719_v33 = vld [vmem:[%s1873_s22 + $0x60] sm:$0xff]   ;;  %v1720_v35 = vld [vmem:[%s1873_s22 + $0x68] sm:$0xff]   ;;  %v1713_v36 = vld [vmem:[%s1873_s22 + $0x30] sm:$0xff]  }
  0x2c   : > { %1598 = vmatprep.subr.bf16.mxu0 %v1701_v18  ;;  %1644 = vmatprep.subr.bf16.mxu1 %v1701_v18  ;;  %v1721_v37 = vld [vmem:[%s1873_s22 + $0x70] sm:$0xff]   ;;  %v1714_v38 = vld [vmem:[%s1873_s22 + $0x38] sm:$0xff]  }
  0x2d   : > { %v1722_v39 = vld [vmem:[%s1873_s22 + $0x78] sm:$0xff]  }
  0x2f   : > { %1599 = vmatpush3.bf16.msra.mxu0 %v1701_v18  ;;  %1652 = vmatpush3.bf16.msra.mxu1 %v1701_v18 }
  0x30   : > { %1600 = vmatprep.subr.bf16.mxu0 %v1702_v19  ;;  %1645 = vmatprep.subr.bf16.mxu1 %v1702_v19 }
  0x33   : > { %1601 = vmatpush3.bf16.msra.mxu0 %v1702_v19  ;;  %1653 = vmatpush3.bf16.msra.mxu1 %v1702_v19 }
  0x34   : > { %1602 = vmatprep.subr.bf16.mxu0 %v1703_v21  ;;  %1646 = vmatprep.subr.bf16.mxu1 %v1703_v21 }
  0x37   : > { %1603 = vmatpush3.bf16.msra.mxu0 %v1703_v21  ;;  %1654 = vmatpush3.bf16.msra.mxu1 %v1703_v21 }
  0x38   : > { %1604 = vmatprep.subr.bf16.mxu0 %v1704_v22  ;;  %1647 = vmatprep.subr.bf16.mxu1 %v1704_v22 }
  0x3b   : > { %1605 = vmatpush3.bf16.msra.mxu0 %v1704_v22  ;;  %1655 = vmatpush3.bf16.msra.mxu1 %v1704_v22 }
  0x3c   : > { %1606 = vmatprep.subr.bf16.mxu0 %v1705_v24  ;;  %1648 = vmatprep.subr.bf16.mxu1 %v1705_v24 }
  0x3f   : > { %1607 = vmatpush3.bf16.msra.mxu0 %v1705_v24  ;;  %1656 = vmatpush3.bf16.msra.mxu1 %v1705_v24 }
  0x40   : > { %1608 = vmatprep.subr.bf16.mxu0 %v1706_v25  ;;  %1649 = vmatprep.subr.bf16.mxu1 %v1706_v25 }
  0x43   : > { %1609 = vmatpush3.bf16.msra.mxu0 %v1706_v25  ;;  %1657 = vmatpush3.bf16.msra.mxu1 %v1706_v25 }
  0x46   : > { %1611 = vmatmul.mubr.bf16.vlgmr.msra.gmra.mxu0 %v1708_v26  ;;  %1627 = vmatmul.mubr.bf16.vlgmr.msra.gmra.mxu1 %v1716_v27 }
  0x47   : > { %1614 = vmatprep.mubr.bf16.mxu0 %v1709_v28  ;;  %1630 = vmatprep.mubr.bf16.mxu1 %v1717_v29 }
  0x4e   : > { %1615 = vmatmul.mubr.bf16.gmra.mxu0 %v1710_v30  ;;  %1631 = vmatmul.mubr.bf16.gmra.mxu1 %v1718_v31 }
  0x4f   : > { %1618 = vmatprep.mubr.bf16.mxu0 %v1711_v32  ;;  %1634 = vmatprep.mubr.bf16.mxu1 %v1719_v33 }
  0x56   : > { %1619 = vmatmul.mubr.bf16.gmra.mxu0 %v1712_v34  ;;  %1635 = vmatmul.mubr.bf16.gmra.mxu1 %v1720_v35 }
  0x57   : > { %1622 = vmatprep.mubr.bf16.mxu0 %v1713_v36  ;;  %1638 = vmatprep.mubr.bf16.mxu1 %v1721_v37 }
  0x5e   : > { %1623 = vmatmul.mubr.bf16.gmra.mxu0 %v1714_v38  ;;  %1639 = vmatmul.mubr.bf16.gmra.mxu1 %v1722_v39 }
 0x106   : > { %v1917_v41 = vpop.f32.mrf.mxu0  ;;  %v1919_v42 = vpop.f32.mrf.mxu1 }
 0x108   : > { %v1921_v43 = vpop.f32.mrf.mxu0  ;;  %v1923_v44 = vpop.f32.mrf.mxu1 }
 0x10a   : > { %v1925_v45 = vpop.f32.mrf.mxu0  ;;  %v1927_v46 = vpop.f32.mrf.mxu1 }
 0x10b   : > { %v1483_v47 = vpack.c.bf16 %v1925_v45, %v1917_v41  ;;  %v1523_v48 = vpack.c.bf16 %v1927_v46, %v1919_v42 }
 0x10c   : > { %v1933_v49 = vpop.f32.mrf.mxu0  ;;  %v1935_v50 = vpop.f32.mrf.mxu1 }
 0x10d   : > { %1555 = vst [vmem:[%s1938_s21 + $0x8] sm:$0xff] %v1483_v47   ;;  %v1478_v51 = vpack.c.bf16 %v1933_v49, %v1921_v43  ;;  %v918_v52 = vadd.f32 %v1933_v49, %v1921_v43  ;;  %1563 = vst [vmem:[%s1938_s21 + $0x48] sm:$0xff] %v1523_v48   ;;  %v1518_v53 = vpack.c.bf16 %v1935_v50, %v1923_v44 }
 0x10e   : > { %v1948_v54 = vpop.f32.mrf.mxu0  ;;  %v1950_v55 = vpop.f32.mrf.mxu1 }
 0x10f   : > { %1479 = vst [vmem:[%s1938_s21] sm:$0xff] %v1478_v51   ;;  %v919_v56 = vadd.f32 %v1917_v41, %v918_v52  ;;  %1562 = vst [vmem:[%s1938_s21 + $0x40] sm:$0xff] %v1518_v53  }
 0x110   : > { %v1955_v57 = vpop.f32.mrf.mxu0  ;;  %v1957_v58 = vpop.f32.mrf.mxu1 }
 0x111   : > { %v920_v59 = vadd.f32 %v1925_v45, %v919_v56 }
 0x112   : > { %v1960_v60 = vpop.f32.mrf.mxu0  ;;  %v1962_v61 = vpop.f32.mrf.mxu1 }
 0x113   : > { %v921_v62 = vadd.f32 %v920_v59, %v1955_v57  ;;  %v1493_v63 = vpack.c.bf16 %v1960_v60, %v1948_v54  ;;  %v1533_v0 = vpack.c.bf16 %v1962_v61, %v1950_v55 }
 0x114   : > { %v1969_v1 = vpop.f32.mrf.mxu0  ;;  %v1971_v2 = vpop.f32.mrf.mxu1 }
 0x115   : > { %1557 = vst [vmem:[%s1938_s21 + $0x18] sm:$0xff] %v1493_v63   ;;  %v1488_v3 = vpack.c.bf16 %v1969_v1, %v1955_v57  ;;  %v922_v4 = vadd.f32 %v921_v62, %v1969_v1  ;;  %1565 = vst [vmem:[%s1938_s21 + $0x58] sm:$0xff] %v1533_v0   ;;  %v1528_v5 = vpack.c.bf16 %v1971_v2, %v1957_v58 }
 0x116   : > { %v1980_v6 = vpop.f32.mrf.mxu0  ;;  %v1982_v7 = vpop.f32.mrf.mxu1 }
 0x117   : > { %1556 = vst [vmem:[%s1938_s21 + $0x10] sm:$0xff] %v1488_v3   ;;  %v923_v8 = vadd.f32 %v1948_v54, %v922_v4  ;;  %1564 = vst [vmem:[%s1938_s21 + $0x50] sm:$0xff] %v1528_v5  }
 0x118   : > { %v1987_v9 = vpop.f32.mrf.mxu0  ;;  %v1989_v10 = vpop.f32.mrf.mxu1 }
 0x119   : > { %v924_v11 = vadd.f32 %v1960_v60, %v923_v8 }
 0x11a   : > { %v1992_v12 = vpop.f32.mrf.mxu0  ;;  %v1994_v13 = vpop.f32.mrf.mxu1 }
 0x11b   : > { %v925_v14 = vadd.f32 %v924_v11, %v1987_v9  ;;  %v1503_v15 = vpack.c.bf16 %v1992_v12, %v1980_v6  ;;  %v1543_v16 = vpack.c.bf16 %v1994_v13, %v1982_v7 }
 0x11c   : > { %v2001_v17 = vpop.f32.mrf.mxu0  ;;  %v2003_v18 = vpop.f32.mrf.mxu1 }
 0x11d   : > { %1559 = vst [vmem:[%s1938_s21 + $0x28] sm:$0xff] %v1503_v15   ;;  %v1498_v19 = vpack.c.bf16 %v2001_v17, %v1987_v9  ;;  %v926_v20 = vadd.f32 %v925_v14, %v2001_v17  ;;  %1567 = vst [vmem:[%s1938_s21 + $0x68] sm:$0xff] %v1543_v16   ;;  %v1538_v21 = vpack.c.bf16 %v2003_v18, %v1989_v10 }
 0x11e   : > { %v2012_v22 = vpop.f32.mrf.mxu0  ;;  %v2014_v23 = vpop.f32.mrf.mxu1 }
 0x11f   : > { %1558 = vst [vmem:[%s1938_s21 + $0x20] sm:$0xff] %v1498_v19   ;;  %v927_v24 = vadd.f32 %v1980_v6, %v926_v20  ;;  %1566 = vst [vmem:[%s1938_s21 + $0x60] sm:$0xff] %v1538_v21  }
 0x120   : > { %v2019_v25 = vpop.f32.mrf.mxu0  ;;  %v2021_v26 = vpop.f32.mrf.mxu1 }
 0x121   : > { %v928_v27 = vadd.f32 %v1992_v12, %v927_v24 }
 0x122   : > { %v2024_v28 = vpop.f32.mrf.mxu0  ;;  %v2026_v29 = vpop.f32.mrf.mxu1 }
 0x123   : > { %v929_v30 = vadd.f32 %v928_v27, %v2019_v25  ;;  %v1513_v31 = vpack.c.bf16 %v2024_v28, %v2012_v22  ;;  %v1553_v32 = vpack.c.bf16 %v2026_v29, %v2014_v23 }
 0x124   : > { %v2033_v33 = vpop.f32.mrf.mxu0  ;;  %v2035_v34 = vpop.f32.mrf.mxu1 }
 0x125   : > { %1561 = vst [vmem:[%s1938_s21 + $0x38] sm:$0xff] %v1513_v31   ;;  %v1508_v35 = vpack.c.bf16 %v2033_v33, %v2019_v25  ;;  %v930_v36 = vadd.f32 %v929_v30, %v2033_v33  ;;  %1569 = vst [vmem:[%s1938_s21 + $0x78] sm:$0xff] %v1553_v32   ;;  %v1548_v37 = vpack.c.bf16 %v2035_v34, %v2021_v26 }
 0x127   : > { %1560 = vst [vmem:[%s1938_s21 + $0x30] sm:$0xff] %v1508_v35   ;;  %v931_v38 = vadd.f32 %v2012_v22, %v930_v36  ;;  %1568 = vst [vmem:[%s1938_s21 + $0x70] sm:$0xff] %v1548_v37   ;;  %v1062_v36 = vld [vmem:[%s1908_s10] sm:$0x1] }
 0x129   : > { %v932_v39 = vadd.f32 %v2024_v28, %v931_v38 }
 0x12b   : > { %v933_v40 = vadd.f32 %v932_v39, %v1923_v44 }
 0x12d   : > { %v934_v47 = vadd.f32 %v933_v40, %v1935_v50 }
 0x12f   : > { %v935_v48 = vadd.f32 %v1919_v42, %v934_v47 }
 0x131   : > { %v936_v51 = vadd.f32 %v1927_v46, %v935_v48 }
 0x133   : > { %v937_v52 = vadd.f32 %v936_v51, %v1957_v58 }
 0x135   : > { %v938_v53 = vadd.f32 %v937_v52, %v1971_v2 }
 0x137   : > { %v939_v56 = vadd.f32 %v1950_v55, %v938_v53 }
 0x139   : > { %v940_v59 = vadd.f32 %v1962_v61, %v939_v56 }
 0x13b   : > { %v941_v62 = vadd.f32 %v940_v59, %v1989_v10 }
 0x13d   : > { %v942_v63 = vadd.f32 %v941_v62, %v2003_v18 }
 0x13f   : > { %v943_v0 = vadd.f32 %v1982_v7, %v942_v63 }
 0x141   : > { %v944_v3 = vadd.f32 %v1994_v13, %v943_v0 }
 0x143   : > { %v945_v4 = vadd.f32 %v944_v3, %v2021_v26 }
 0x145   : > { %v946_v5 = vadd.f32 %v945_v4, %v2035_v34 }
 0x147   : > { %v947_v8 = vadd.f32 %v2014_v23, %v946_v5 }
 0x149   : > { %v948_v11 = vadd.f32 %v2026_v29, %v947_v8 }
 0x14b   : > { %v949_v14 = vrot.slane %v948_v11, 4 }
 0x14d   : > { %v950_v15 = vadd.f32 %v949_v14, %v948_v11 }
 0x14f   : > { %v951_v16 = vrot.slane %v950_v15, 2 }
 0x151   : > { %v952_v19 = vadd.f32 %v951_v16, %v950_v15 }
 0x153   : > { %v953_v20 = vrot.slane %v952_v19, 1 }
 0x155   : > { %v954_v21 = vadd.f32 %v953_v20, %v952_v19 }
 0x157   : > { %v2064_v24 = vmul.f32 0.00390625, %v954_v21 }
 0x159   : > { %v956_v27 = vsub.f32 %v1921_v43, %v2064_v24  ;;  %v957_v30 = vsub.f32 %v1933_v49, %v2064_v24  ;;  %v958_v31 = vsub.f32 %v1917_v41, %v2064_v24  ;;  %v959_v37 = vsub.f32 %v1925_v45, %v2064_v24 }
 0x15a   : > { %v960_v38 = vsub.f32 %v1955_v57, %v2064_v24  ;;  %v2078_v43 = vsub.f32 %v2064_v24, %v1062_v36  ;;  %v961_v49 = vsub.f32 %v1969_v1, %v2064_v24  ;;  %v962_v51 = vsub.f32 %v1948_v54, %v2064_v24 }
 0x15b   : > { %v988_v32 = vmul.f32 %v956_v27, %v956_v27  ;;  %v989_v35 = vmul.f32 %v957_v30, %v957_v30  ;;  %v990_v39 = vmul.f32 %v958_v31, %v958_v31  ;;  %v991_v47 = vmul.f32 %v959_v37, %v959_v37 }
 0x15c   : > { %v1066_v48 = vadd.f32 %v2078_v43, %v1062_v36  ;;  %v992_v52 = vmul.f32 %v960_v38, %v960_v38  ;;  %v963_v57 = vsub.f32 %v1960_v60, %v2064_v24  ;;  %v993_v53 = vmul.f32 %v961_v49, %v961_v49 }
 0x15d   : > { %v1020_v40 = vadd.f32 %v989_v35, %v988_v32  ;;  %v964_v59 = vsub.f32 %v1987_v9, %v2064_v24  ;;  %v994_v62 = vmul.f32 %v962_v51, %v962_v51  ;;  %v965_v63 = vsub.f32 %v2001_v17, %v2064_v24 }
 0x15e   : > { %1067 = vst [vmem:[%s1908_s10] sm:$0x1] %v1066_v48  ;;  %v995_v0 = vmul.f32 %v963_v57, %v963_v57  ;;  %v966_v54 = vsub.f32 %v1980_v6, %v2064_v24  ;;  %v967_v60 = vsub.f32 %v1992_v12, %v2064_v24  ;;  %v968_v9 = vsub.f32 %v2019_v25, %v2064_v24 }
 0x15f   : > { %v1021_v41 = vadd.f32 %v1020_v40, %v990_v39  ;;  %v996_v4 = vmul.f32 %v964_v59, %v964_v59  ;;  %v997_v8 = vmul.f32 %v965_v63, %v965_v63  ;;  %v969_v17 = vsub.f32 %v2033_v33, %v2064_v24 }
 0x160   : > { %v998_v14 = vmul.f32 %v966_v54, %v966_v54  ;;  %v999_v16 = vmul.f32 %v967_v60, %v967_v60  ;;  %v970_v6 = vsub.f32 %v2012_v22, %v2064_v24  ;;  %v1000_v20 = vmul.f32 %v968_v9, %v968_v9 }
 0x161   : > { %v1022_v45 = vadd.f32 %v1021_v41, %v991_v47  ;;  %v971_v12 = vsub.f32 %v2024_v28, %v2064_v24  ;;  %v1001_v27 = vmul.f32 %v969_v17, %v969_v17  ;;  %v972_v25 = vsub.f32 %v1923_v44, %v2064_v24 }
 0x162   : > { %v1002_v31 = vmul.f32 %v970_v6, %v970_v6  ;;  %v973_v33 = vsub.f32 %v1935_v50, %v2064_v24  ;;  %v974_v22 = vsub.f32 %v1919_v42, %v2064_v24  ;;  %v975_v28 = vsub.f32 %v1927_v46, %v2064_v24 }
 0x163   : > { %v1023_v56 = vadd.f32 %v1022_v45, %v992_v52  ;;  %v1003_v35 = vmul.f32 %v971_v12, %v971_v12  ;;  %v1004_v37 = vmul.f32 %v972_v25, %v972_v25  ;;  %v976_v44 = vsub.f32 %v1957_v58, %v2064_v24 }
 0x164   : > { %v1005_v39 = vmul.f32 %v973_v33, %v973_v33  ;;  %v1006_v49 = vmul.f32 %v974_v22, %v974_v22  ;;  %v977_v50 = vsub.f32 %v1971_v2, %v2064_v24  ;;  %v1007_v41 = vmul.f32 %v975_v28, %v975_v28  ;;  %v1122_v33 = vld [vmem:[%s1938_s21 + $0x18] sm:$0xff] (%p1824_p6)   ;;  %v1134_v22 = vld [vmem:[%s1938_s21 + $0x30] sm:$0xff] (%p1824_p6)   ;;  %v1146_v28 = vld [vmem:[%s1938_s21 + $0x48] sm:$0xff] (%p1824_p6)  }
 0x165   : > { %v1024_v1 = vadd.f32 %v1023_v56, %v993_v53  ;;  %v978_v42 = vsub.f32 %v1950_v55, %v2064_v24  ;;  %v1008_v51 = vmul.f32 %v976_v44, %v976_v44  ;;  %v979_v46 = vsub.f32 %v1962_v61, %v2064_v24  ;;  %1123 = vst [vmem:[%s1093_s23 + $0x18] sm:$0xff] (%p1824_p6), %v1122_v33   ;;  %v1158_v44 = vld [vmem:[%s1938_s21 + $0x60] sm:$0xff] (%p1824_p6)  }
 0x166   : > { %v1009_v45 = vmul.f32 %v977_v50, %v977_v50  ;;  %v980_v58 = vsub.f32 %v1989_v10, %v2064_v24  ;;  %v981_v2 = vsub.f32 %v2003_v18, %v2064_v24  ;;  %v982_v55 = vsub.f32 %v1982_v7, %v2064_v24  ;;  %1135 = vst [vmem:[%s1093_s23 + $0x50] sm:$0xff] (%p1824_p6), %v1134_v22   ;;  %v1170_v50 = vld [vmem:[%s1938_s21 + $0x78] sm:$0xff] (%p1824_p6)  }
 0x167   : > { %v1025_v3 = vadd.f32 %v1024_v1, %v994_v62  ;;  %v1010_v53 = vmul.f32 %v978_v42, %v978_v42  ;;  %v1011_v59 = vmul.f32 %v979_v46, %v979_v46  ;;  %v983_v61 = vsub.f32 %v1994_v13, %v2064_v24  ;;  %1147 = vst [vmem:[%s1093_s23 + $0x88] sm:$0xff] (%p1824_p6), %v1146_v28  }
 0x168   : > { %v1012_v1 = vmul.f32 %v980_v58, %v980_v58  ;;  %v984_v10 = vsub.f32 %v2021_v26, %v2064_v24  ;;  %v1014_v54 = vmul.f32 %v982_v55, %v982_v55  ;;  %v985_v18 = vsub.f32 %v2035_v34, %v2064_v24  ;;  %1159 = vst [vmem:[%s1093_s23 + $0xc0] sm:$0xff] (%p1824_p6), %v1158_v44  }
 0x169   : > { %v1026_v5 = vadd.f32 %v1025_v3, %v995_v0  ;;  %v1013_v0 = vmul.f32 %v981_v2, %v981_v2  ;;  %v986_v7 = vsub.f32 %v2014_v23, %v2064_v24  ;;  %v987_v13 = vsub.f32 %v2026_v29, %v2064_v24  ;;  %v1068_v29 = vld [vmem:[%s1913_s14] sm:$0x1]  ;;  %1171 = vst [vmem:[%s1093_s23 + $0xd8] sm:$0xff] (%p1824_p6), %v1170_v50  }
 0x16a   : > { %v1017_v9 = vmul.f32 %v985_v18, %v985_v18  ;;  %v1069_v23 = vmul.f32 %v2078_v43, %v2078_v43  ;;  %v1110_v43 = vld [vmem:[%s1938_s21] sm:$0xff] (%p1824_p6)  }
 0x16b   : > { %v1027_v11 = vadd.f32 %v1026_v5, %v996_v4  ;;  %v1015_v5 = vmul.f32 %v983_v61, %v983_v61  ;;  %v1019_v17 = vmul.f32 %v987_v13, %v987_v13  ;;  %1111 = vst [vmem:[%s1093_s23] sm:$0xff] (%p1824_p6), %v1110_v43  }
 0x16d   : > { %v1028_v15 = vadd.f32 %v1027_v11, %v997_v8  ;;  %v1016_v8 = vmul.f32 %v984_v10, %v984_v10 }
 0x16f   : > { %v1029_v19 = vadd.f32 %v1028_v15, %v998_v14  ;;  %v1018_v15 = vmul.f32 %v986_v7, %v986_v7 }
 0x171   : > { %v1030_v21 = vadd.f32 %v1029_v19, %v999_v16 }
 0x173   : > { %v1031_v30 = vadd.f32 %v1030_v21, %v1000_v20 }
 0x175   : > { %v1032_v32 = vadd.f32 %v1031_v30, %v1001_v27  ;;  %v1073_v30 = vmul.f32 0.0, %v1069_v23 }
 0x177   : > { %v1033_v36 = vadd.f32 %v1032_v32, %v1002_v31  ;;  %v1114_v31 = vld [vmem:[%s1938_s21 + $0x8] sm:$0xff] (%p1824_p6)   ;;  %v1118_v32 = vld [vmem:[%s1938_s21 + $0x10] sm:$0xff] (%p1824_p6)  }
 0x178   : > { %1115 = vst [vmem:[%s1093_s23 + $0x8] sm:$0xff] (%p1824_p6), %v1114_v31   ;;  %1119 = vst [vmem:[%s1093_s23 + $0x10] sm:$0xff] (%p1824_p6), %v1118_v32  }
 0x179   : > { %v1034_v38 = vadd.f32 %v1033_v36, %v1003_v35  ;;  %v1126_v35 = vld [vmem:[%s1938_s21 + $0x20] sm:$0xff] (%p1824_p6)   ;;  %v1130_v36 = vld [vmem:[%s1938_s21 + $0x28] sm:$0xff] (%p1824_p6)  }
 0x17a   : > { %1127 = vst [vmem:[%s1093_s23 + $0x40] sm:$0xff] (%p1824_p6), %v1126_v35   ;;  %1131 = vst [vmem:[%s1093_s23 + $0x48] sm:$0xff] (%p1824_p6), %v1130_v36  }
 0x17b   : > { %v1035_v40 = vadd.f32 %v1034_v38, %v1004_v37  ;;  %v1138_v37 = vld [vmem:[%s1938_s21 + $0x38] sm:$0xff] (%p1824_p6)   ;;  %v1142_v38 = vld [vmem:[%s1938_s21 + $0x40] sm:$0xff] (%p1824_p6)  }
 0x17c   : > { %1139 = vst [vmem:[%s1093_s23 + $0x58] sm:$0xff] (%p1824_p6), %v1138_v37   ;;  %1143 = vst [vmem:[%s1093_s23 + $0x80] sm:$0xff] (%p1824_p6), %v1142_v38  }
 0x17d   : > { %v1036_v47 = vadd.f32 %v1035_v40, %v1005_v39  ;;  %v1150_v39 = vld [vmem:[%s1938_s21 + $0x50] sm:$0xff] (%p1824_p6)   ;;  %v1154_v40 = vld [vmem:[%s1938_s21 + $0x58] sm:$0xff] (%p1824_p6)  }
 0x17e   : > { %1151 = vst [vmem:[%s1093_s23 + $0x90] sm:$0xff] (%p1824_p6), %v1150_v39   ;;  %1155 = vst [vmem:[%s1093_s23 + $0x98] sm:$0xff] (%p1824_p6), %v1154_v40  }
 0x17f   : > { %v1037_v48 = vadd.f32 %v1036_v47, %v1006_v49  ;;  %v1162_v49 = vld [vmem:[%s1938_s21 + $0x68] sm:$0xff] (%p1824_p6)   ;;  %v1166_v47 = vld [vmem:[%s1938_s21 + $0x70] sm:$0xff] (%p1824_p6)  }
 0x180   : > { %1163 = vst [vmem:[%s1093_s23 + $0xc8] sm:$0xff] (%p1824_p6), %v1162_v49   ;;  %1167 = vst [vmem:[%s1093_s23 + $0xd0] sm:$0xff] (%p1824_p6), %v1166_v47  }
 0x181   : > { %v1038_v52 = vadd.f32 %v1037_v48, %v1007_v41 }
 0x183   : > { %v1039_v57 = vadd.f32 %v1038_v52, %v1008_v51 }
 0x185   : > { %v1040_v56 = vadd.f32 %v1039_v57, %v1009_v45 }
 0x187   : > { %v1041_v62 = vadd.f32 %v1040_v56, %v1010_v53 }
 0x189   : > { %v1042_v63 = vadd.f32 %v1041_v62, %v1011_v59 }
 0x18b   : > { %v1043_v3 = vadd.f32 %v1042_v63, %v1012_v1 }
 0x18d   : > { %v1044_v4 = vadd.f32 %v1043_v3, %v1013_v0 }
 0x18f   : > { %v1045_v60 = vadd.f32 %v1044_v4, %v1014_v54 }
 0x191   : > { %v1046_v11 = vadd.f32 %v1045_v60, %v1015_v5 }
 0x193   : > { %v1047_v14 = vadd.f32 %v1046_v11, %v1016_v8 }
 0x195   : > { %v1048_v26 = vadd.f32 %v1047_v14, %v1017_v9 }
 0x197   : > { %v1049_v16 = vadd.f32 %v1048_v26, %v1018_v15 }
 0x199   : > { %v1050_v19 = vadd.f32 %v1049_v16, %v1019_v17 }
 0x19b   : > { %v1051_v34 = vrot.slane %v1050_v19, 4 }
 0x19d   : > { %v1052_v6 = vadd.f32 %v1051_v34, %v1050_v19 }
 0x19f   : > { %v1053_v20 = vrot.slane %v1052_v6, 2 }
 0x1a1   : > { %v1054_v21 = vadd.f32 %v1053_v20, %v1052_v6 }
 0x1a3   : > { %v1055_v12 = vrot.slane %v1054_v21, 1 }
 0x1a5   : > { %v1056_v27 = vadd.f32 %v1055_v12, %v1054_v21 }
 0x1a7   : > { %v1074_v24 = vadd.f32 %v1073_v30, %v1056_v27  ;;  %1089 = sbr.rel (!%p1824_p6) target bundleno = 428 (0x1ac), region = 77 }
 0x1a9   : > { %v1075_v25 = vadd.f32 %v1074_v24, %v1068_v29 }
 0x1ab   : > { %1076 = vst [vmem:[%s1913_s14] sm:$0x1] %v1075_v25 }
 0x1ac PF: > { %s15_s19 = sadd.s32 1, %s1761_s19   ;;  %s2183_s15 = smov %s1749_s16 }
 0x1ad   : > { %p12_p12 = scmp.ge.s32.totalorder %s15_s19, 4   ;;  %s2184_s16 = smov %s1829_s25 }
 0x1ae   : > { %s2185_s17 = smov %s1757_s18  ;;  %s2186_s18 = smov %s2188_s20 }
 0x1af   :  { %14 = sbr.rel (!%p12_p12) target bundleno = 3 (0x3), region = 173 }

// kernel: transition_layer.3
= control target key start
LH: loop header
LB: loop body
LE: loop exit
PB: predicated region body
PF: predicated region fallthrough
CT: control target
= control target key end

     0   :  { %s772_s12 = smov 0   ;;  %s774_s13 = smov 0   ;;  %s948_s0 = inlined_call_operand.vmem [shape: bf16[4,128,128], index: 0, kind: input, shape index: {}]   ;;  %s949_s1 = inlined_call_operand.vmem [shape: f32[1,128], index: 1, kind: input, shape index: {}]   ;;  %s950_s2 = inlined_call_operand.vmem [shape: f32[1,128], index: 2, kind: input, shape index: {}]   ;;  %s951_s3 = inlined_call_operand.vmem [shape: f32[128,128], index: 3, kind: output, shape index: {}]  }
   0x1   :  { %s776_s14 = smov 0  }
   0x2 LB: > { %s609_s15 = sadd.s32 4294967295, %s750_s14   ;;  %s789_s16 = sadd.s32 1, %s750_s14   ;;  %s750_s14 = sphi %s776_s14, %s954_s14   ;;  %s746_s13 = sphi %s774_s13, %s953_s13   ;;  %s742_s12 = sphi %s772_s12, %s952_s12  }
   0x3   : > { %s17_s17 = ssub.s32 %s750_s14, %s789_s16  ;;  %s20_s18 = sadd.s32 1, %s746_s13 }
   0x4   : > { %p18_p0 = scmp.eq.s32.totalorder %s17_s17, 0  ;;  %p27_p1 = scmp.ne.s32.totalorder %s746_s13, %s742_s12 }
   0x5   : > { %p28_p2 = scmp.eq.s32.totalorder %s750_s14, 0  ;;  %p612_p4 = scmp.ge.s32.totalorder %s750_s14, 2 }
   0x6   : > { %s798_s19 = scalar_select %p18_p0, %s746_s13, %s20_s18  }
   0x7   : > { %p29_p3 = por %p28_p2, %p27_p1  ;;  %127 = sbr.rel (%p612_p4) target bundleno = 24 (0x18), region = 24 }
   0xc   : > { %130 = sbr.rel (!%p29_p3) target bundleno = 24 (0x18), region = 28  ;;  %s132_s20 = sand.u32 (%p29_p3), 1, %s746_s13  }
   0xd   : > { %s624_s21 = sshll.u32 (%p29_p3), %s750_s14, 5  ;;  %s613_s22 = sshll.u32 (%p29_p3), %s132_s20, 7 }
   0xe   : > { %s806_s25 = scalar_lea.vmem (%p29_p3), %s948_s0, %s624_s21  ;;  %s134_s26 = scalar_lea.vmem (%p29_p3), [#allocation2], %s613_s22 }
   0xf   : > { %v154_v0 = vld [vmem:[%s806_s25] sm:$0xff] (%p29_p3)   ;;  %v158_v1 = vld [vmem:[%s806_s25 + $0x8] sm:$0xff] (%p29_p3)   ;;  %v162_v2 = vld [vmem:[%s806_s25 + $0x10] sm:$0xff] (%p29_p3)  }
  0x10   : > { %155 = vst [vmem:[%s134_s26] sm:$0xff] (%p29_p3), %v154_v0   ;;  %159 = vst [vmem:[%s134_s26 + $0x8] sm:$0xff] (%p29_p3), %v158_v1   ;;  %v166_v3 = vld [vmem:[%s806_s25 + $0x18] sm:$0xff] (%p29_p3)   ;;  %v170_v4 = vld [vmem:[%s806_s25 + $0x40] sm:$0xff] (%p29_p3)  }
  0x11   : > { %163 = vst [vmem:[%s134_s26 + $0x10] sm:$0xff] %v162_v2   ;;  %v174_v5 = vld [vmem:[%s806_s25 + $0x48] sm:$0xff]   ;;  %167 = vst [vmem:[%s134_s26 + $0x18] sm:$0xff] %v166_v3   ;;  %v178_v6 = vld [vmem:[%s806_s25 + $0x50] sm:$0xff]  }
  0x12   : > { %171 = vst [vmem:[%s134_s26 + $0x20] sm:$0xff] %v170_v4   ;;  %175 = vst [vmem:[%s134_s26 + $0x28] sm:$0xff] %v174_v5   ;;  %v182_v7 = vld [vmem:[%s806_s25 + $0x58] sm:$0xff]   ;;  %v186_v8 = vld [vmem:[%s806_s25 + $0x80] sm:$0xff]  }
  0x13   : > { %179 = vst [vmem:[%s134_s26 + $0x30] sm:$0xff] %v178_v6   ;;  %183 = vst [vmem:[%s134_s26 + $0x38] sm:$0xff] %v182_v7   ;;  %v190_v9 = vld [vmem:[%s806_s25 + $0x88] sm:$0xff]   ;;  %v194_v10 = vld [vmem:[%s806_s25 + $0x90] sm:$0xff]  }
  0x14   : > { %187 = vst [vmem:[%s134_s26 + $0x40] sm:$0xff] %v186_v8   ;;  %v198_v11 = vld [vmem:[%s806_s25 + $0x98] sm:$0xff]   ;;  %191 = vst [vmem:[%s134_s26 + $0x48] sm:$0xff] %v190_v9   ;;  %v202_v12 = vld [vmem:[%s806_s25 + $0xc0] sm:$0xff]  }
  0x15   : > { %195 = vst [vmem:[%s134_s26 + $0x50] sm:$0xff] %v194_v10   ;;  %199 = vst [vmem:[%s134_s26 + $0x58] sm:$0xff] %v198_v11   ;;  %v206_v13 = vld [vmem:[%s806_s25 + $0xc8] sm:$0xff]   ;;  %v210_v14 = vld [vmem:[%s806_s25 + $0xd0] sm:$0xff]  }
  0x16   : > { %203 = vst [vmem:[%s134_s26 + $0x60] sm:$0xff] %v202_v12   ;;  %207 = vst [vmem:[%s134_s26 + $0x68] sm:$0xff] %v206_v13   ;;  %v214_v15 = vld [vmem:[%s806_s25 + $0xd8] sm:$0xff]  }
  0x17   : > { %211 = vst [vmem:[%s134_s26 + $0x70] sm:$0xff] %v210_v14   ;;  %215 = vst [vmem:[%s134_s26 + $0x78] sm:$0xff] %v214_v15  }
  0x18 PF: > { %p616_p5 = scmp.ge.s32.totalorder %s750_s14, 1  ;;  %p304_p6 = scmp.lt.s32.totalorder %s750_s14, 3 }
  0x1a   : > { %p305_p7 = pnand %p616_p5, %p304_p6 }
  0x1b   : > { %s311_s27 = sand.u32 (!%p305_p7), 1, %s742_s12   ;;  %s618_s29 = sshll.u32 (!%p305_p7), %s609_s15, 3 }
  0x1c   : > { %308 = sbr.rel (%p305_p7) target bundleno = 80 (0x50), region = 69  ;;  %s617_s28 = sshll.u32 (!%p305_p7), %s311_s27, 7 }
  0x1d   : > { %s834_s5 = scalar_lea.vmem (!%p305_p7), [#allocation2], %s617_s28  ;;  %p336_p8 = scmp.lt.s32.totalorder (!%p305_p7), %s618_s29, 15 }
  0x21   : > { %v832_v16 = vld [vmem:[%s949_s1] ss:$0 sm:$0xff]  ;;  %s956_s29 = smov (!%p336_p8, %s618_s29), 15  ;;  %v689_v46 = vld [vmem:[%s834_s5 + $0x8] sm:$0xff]  }
  0x22   : > { %v626_v17 = vld [vmem:[%s834_s5] sm:$0xff]   ;;  %v693_v47 = vld [vmem:[%s834_s5 + $0x28] sm:$0xff]   ;;  %s619_s8 = sshll.u32 %s956_s29, 3  ;;  %v631_v59 = vunpack.c.l.bf16 %v689_v46  ;;  %v632_v0 = vunpack.c.h.bf16 %v689_v46 }
  0x23   : > { %v692_v18 = vld [vmem:[%s834_s5 + $0x20] sm:$0xff]   ;;  %v627_v20 = vunpack.c.l.bf16 %v626_v17  ;;  %v628_v24 = vunpack.c.h.bf16 %v626_v17  ;;  %v697_v48 = vld [vmem:[%s834_s5 + $0x48] sm:$0xff]   ;;  %v647_v60 = vunpack.c.l.bf16 %v693_v47  ;;  %v648_v1 = vunpack.c.h.bf16 %v693_v47  ;;  %s875_s11 = scalar_lea.vmem %s951_s3, %s619_s8 }
  0x24   : > { %v696_v19 = vld [vmem:[%s834_s5 + $0x40] sm:$0xff]   ;;  %v643_v21 = vunpack.c.l.bf16 %v692_v18  ;;  %v644_v27 = vunpack.c.h.bf16 %v692_v18  ;;  %v701_v53 = vld [vmem:[%s834_s5 + $0x68] sm:$0xff]   ;;  %v663_v61 = vunpack.c.l.bf16 %v697_v48  ;;  %v414_v3 = vmul.f32 %v631_v59, %v832_v16 }
  0x25   : > { %v659_v22 = vunpack.c.l.bf16 %v696_v19  ;;  %v700_v23 = vld [vmem:[%s834_s5 + $0x60] sm:$0xff]   ;;  %v660_v28 = vunpack.c.h.bf16 %v696_v19  ;;  %v412_v30 = vmul.f32 %v627_v20, %v832_v16  ;;  %v413_v33 = vmul.f32 %v628_v24, %v832_v16  ;;  %v690_v19 = vld [vmem:[%s834_s5 + $0x10] sm:$0xff]  }
  0x26   : > { %v675_v25 = vunpack.c.l.bf16 %v700_v23  ;;  %v843_v26 = vld [vmem:[%s950_s2] ss:$0 sm:$0xff]  ;;  %v676_v29 = vunpack.c.h.bf16 %v700_v23  ;;  %v420_v31 = vmul.f32 %v643_v21, %v832_v16  ;;  %v421_v35 = vmul.f32 %v644_v27, %v832_v16  ;;  %v694_v20 = vld [vmem:[%s834_s5 + $0x30] sm:$0xff]  }
  0x27   : > { %v428_v32 = vmul.f32 %v659_v22, %v832_v16  ;;  %v429_v36 = vmul.f32 %v660_v28, %v832_v16  ;;  %v451_v38 = vadd.f32 %v843_v26, %v412_v30  ;;  %v452_v41 = vadd.f32 %v843_v26, %v413_v33 }
  0x28   : > { %v436_v34 = vmul.f32 %v675_v25, %v832_v16  ;;  %v437_v37 = vmul.f32 %v676_v29, %v832_v16  ;;  %v459_v39 = vadd.f32 %v843_v26, %v420_v31  ;;  %v460_v43 = vadd.f32 %v843_v26, %v421_v35  ;;  %v698_v25 = vld [vmem:[%s834_s5 + $0x50] sm:$0xff]  }
  0x29   : > { %v467_v40 = vadd.f32 %v843_v26, %v428_v32  ;;  %v468_v44 = vadd.f32 %v843_v26, %v429_v36  ;;  %v483_v49 = vmax.f32 %v451_v38, 0.0  ;;  %v484_v52 = vmax.f32 %v452_v41, 0.0  ;;  %v702_v31 = vld [vmem:[%s834_s5 + $0x70] sm:$0xff]  }
  0x2a   : > { %v475_v42 = vadd.f32 %v843_v26, %v436_v34  ;;  %v476_v45 = vadd.f32 %v843_v26, %v437_v37  ;;  %v491_v50 = vmax.f32 %v459_v39, 0.0  ;;  %v492_v55 = vmax.f32 %v460_v43, 0.0 }
  0x2b   : > { %v499_v51 = vmax.f32 %v467_v40, 0.0  ;;  %v500_v56 = vmax.f32 %v468_v44, 0.0  ;;  %v679_v63 = vunpack.c.l.bf16 %v701_v53  ;;  %v422_v4 = vmul.f32 %v647_v60, %v832_v16  ;;  %v691_v60 = vld [vmem:[%s834_s5 + $0x18] sm:$0xff]  }
  0x2c   : > { %v507_v54 = vmax.f32 %v475_v42, 0.0  ;;  %v508_v57 = vmax.f32 %v476_v45, 0.0  ;;  %v515_v58 = vadd.f32 %v491_v50, %v483_v49  ;;  %v516_v62 = vadd.f32 %v492_v55, %v484_v52 }
  0x2d   : > { %v430_v5 = vmul.f32 %v663_v61, %v832_v16  ;;  %v438_v7 = vmul.f32 %v679_v63, %v832_v16  ;;  %v664_v8 = vunpack.c.h.bf16 %v697_v48  ;;  %v680_v9 = vunpack.c.h.bf16 %v701_v53  ;;  %v695_v61 = vld [vmem:[%s834_s5 + $0x38] sm:$0xff]  }
  0x2e   : > { %v523_v2 = vadd.f32 %v515_v58, %v499_v51  ;;  %v524_v6 = vadd.f32 %v516_v62, %v500_v56  ;;  %v453_v11 = vadd.f32 %v843_v26, %v414_v3  ;;  %v461_v12 = vadd.f32 %v843_v26, %v422_v4 }
  0x2f   : > { %v469_v13 = vadd.f32 %v843_v26, %v430_v5  ;;  %v477_v15 = vadd.f32 %v843_v26, %v438_v7  ;;  %v415_v17 = vmul.f32 %v632_v0, %v832_v16  ;;  %v423_v18 = vmul.f32 %v648_v1, %v832_v16  ;;  %v703_v7 = vld [vmem:[%s834_s5 + $0x78] sm:$0xff]  }
  0x30   : > { %v531_v10 = vadd.f32 %v523_v2, %v507_v54  ;;  %v532_v14 = vadd.f32 %v524_v6, %v508_v57  ;;  %v485_v21 = vmax.f32 %v453_v11, 0.0  ;;  %v493_v22 = vmax.f32 %v461_v12, 0.0  ;;  %v699_v2 = vld [vmem:[%s834_s5 + $0x58] sm:$0xff]  }
  0x31   : > { %v501_v23 = vmax.f32 %v469_v13, 0.0  ;;  %v431_v24 = vmul.f32 %v664_v8, %v832_v16  ;;  %v509_v27 = vmax.f32 %v477_v15, 0.0  ;;  %v439_v28 = vmul.f32 %v680_v9, %v832_v16 }
  0x32   : > { %539 = vst [vmem:[%s875_s11] sm:$0xff] %v531_v10  ;;  %540 = vst [vmem:[%s875_s11 + $0x8] sm:$0xff] %v532_v14  ;;  %v454_v29 = vadd.f32 %v843_v26, %v415_v17  ;;  %v462_v30 = vadd.f32 %v843_v26, %v423_v18  ;;  %v517_v32 = vadd.f32 %v493_v22, %v485_v21  ;;  %v635_v34 = vunpack.c.l.bf16 %v690_v19 }
  0x33   : > { %v470_v33 = vadd.f32 %v843_v26, %v431_v24  ;;  %v651_v35 = vunpack.c.l.bf16 %v694_v20  ;;  %v478_v36 = vadd.f32 %v843_v26, %v439_v28  ;;  %v667_v39 = vunpack.c.l.bf16 %v698_v25 }
  0x34   : > { %v486_v37 = vmax.f32 %v454_v29, 0.0  ;;  %v494_v38 = vmax.f32 %v462_v30, 0.0  ;;  %v525_v40 = vadd.f32 %v517_v32, %v501_v23  ;;  %v683_v42 = vunpack.c.l.bf16 %v702_v31 }
  0x35   : > { %v502_v41 = vmax.f32 %v470_v33, 0.0  ;;  %v416_v43 = vmul.f32 %v635_v34, %v832_v16  ;;  %v510_v44 = vmax.f32 %v478_v36, 0.0  ;;  %v424_v46 = vmul.f32 %v651_v35, %v832_v16 }
  0x36   : > { %v518_v45 = vadd.f32 %v494_v38, %v486_v37  ;;  %v432_v47 = vmul.f32 %v667_v39, %v832_v16  ;;  %v533_v48 = vadd.f32 %v525_v40, %v509_v27  ;;  %v440_v49 = vmul.f32 %v683_v42, %v832_v16 }
  0x37   : > { %v455_v50 = vadd.f32 %v843_v26, %v416_v43  ;;  %v636_v51 = vunpack.c.h.bf16 %v690_v19  ;;  %v463_v53 = vadd.f32 %v843_v26, %v424_v46  ;;  %v652_v55 = vunpack.c.h.bf16 %v694_v20 }
  0x38   : > { %v526_v52 = vadd.f32 %v518_v45, %v502_v41  ;;  %v471_v54 = vadd.f32 %v843_v26, %v432_v47  ;;  %541 = vst [vmem:[%s875_s11 + $0x10] sm:$0xff] %v533_v48  ;;  %v479_v56 = vadd.f32 %v843_v26, %v440_v49  ;;  %v668_v58 = vunpack.c.h.bf16 %v698_v25 }
  0x39   : > { %v487_v57 = vmax.f32 %v455_v50, 0.0  ;;  %v684_v59 = vunpack.c.h.bf16 %v702_v31  ;;  %v495_v63 = vmax.f32 %v463_v53, 0.0  ;;  %v417_v1 = vmul.f32 %v636_v51, %v832_v16 }
  0x3a   : > { %v534_v62 = vadd.f32 %v526_v52, %v510_v44  ;;  %v503_v0 = vmax.f32 %v471_v54, 0.0  ;;  %v511_v3 = vmax.f32 %v479_v56, 0.0  ;;  %v425_v4 = vmul.f32 %v652_v55, %v832_v16 }
  0x3b   : > { %v433_v5 = vmul.f32 %v668_v58, %v832_v16  ;;  %v441_v6 = vmul.f32 %v684_v59, %v832_v16  ;;  %v519_v8 = vadd.f32 %v495_v63, %v487_v57  ;;  %v456_v9 = vadd.f32 %v843_v26, %v417_v1 }
  0x3c   : > { %542 = vst [vmem:[%s875_s11 + $0x18] sm:$0xff] %v534_v62  ;;  %v639_v10 = vunpack.c.l.bf16 %v691_v60  ;;  %v655_v11 = vunpack.c.l.bf16 %v695_v61  ;;  %v464_v12 = vadd.f32 %v843_v26, %v425_v4  ;;  %v671_v15 = vunpack.c.l.bf16 %v699_v2 }
  0x3d   : > { %v472_v13 = vadd.f32 %v843_v26, %v433_v5  ;;  %v480_v14 = vadd.f32 %v843_v26, %v441_v6  ;;  %v527_v17 = vadd.f32 %v519_v8, %v503_v0  ;;  %v488_v18 = vmax.f32 %v456_v9, 0.0 }
  0x3e   : > { %v687_v19 = vunpack.c.l.bf16 %v703_v7  ;;  %v418_v20 = vmul.f32 %v639_v10, %v832_v16  ;;  %v496_v21 = vmax.f32 %v464_v12, 0.0  ;;  %v426_v24 = vmul.f32 %v655_v11, %v832_v16 }
  0x3f   : > { %v504_v22 = vmax.f32 %v472_v13, 0.0  ;;  %v512_v23 = vmax.f32 %v480_v14, 0.0  ;;  %v535_v25 = vadd.f32 %v527_v17, %v511_v3  ;;  %v434_v27 = vmul.f32 %v671_v15, %v832_v16 }
  0x40   : > { %v442_v28 = vmul.f32 %v687_v19, %v832_v16  ;;  %v457_v29 = vadd.f32 %v843_v26, %v418_v20  ;;  %v520_v30 = vadd.f32 %v496_v21, %v488_v18  ;;  %v465_v31 = vadd.f32 %v843_v26, %v426_v24 }
  0x41   : > { %v640_v32 = vunpack.c.h.bf16 %v691_v60  ;;  %v656_v33 = vunpack.c.h.bf16 %v695_v61  ;;  %543 = vst [vmem:[%s875_s11 + $0x20] sm:$0xff] %v535_v25  ;;  %v473_v34 = vadd.f32 %v843_v26, %v434_v27  ;;  %v672_v37 = vunpack.c.h.bf16 %v699_v2 }
  0x42   : > { %v481_v35 = vadd.f32 %v843_v26, %v442_v28  ;;  %v489_v36 = vmax.f32 %v457_v29, 0.0  ;;  %v528_v38 = vadd.f32 %v520_v30, %v504_v22  ;;  %v497_v39 = vmax.f32 %v465_v31, 0.0 }
  0x43   : > { %v688_v40 = vunpack.c.h.bf16 %v703_v7  ;;  %v419_v41 = vmul.f32 %v640_v32, %v832_v16  ;;  %v505_v42 = vmax.f32 %v473_v34, 0.0  ;;  %v427_v44 = vmul.f32 %v656_v33, %v832_v16 }
  0x44   : > { %v513_v43 = vmax.f32 %v481_v35, 0.0  ;;  %v435_v45 = vmul.f32 %v672_v37, %v832_v16  ;;  %v536_v46 = vadd.f32 %v528_v38, %v512_v23  ;;  %v521_v47 = vadd.f32 %v497_v39, %v489_v36 }
  0x45   : > { %v443_v48 = vmul.f32 %v688_v40, %v832_v16  ;;  %v458_v49 = vadd.f32 %v843_v26, %v419_v41  ;;  %v466_v50 = vadd.f32 %v843_v26, %v427_v44 }
  0x46   : > { %v474_v51 = vadd.f32 %v843_v26, %v435_v45  ;;  %544 = vst [vmem:[%s875_s11 + $0x28] sm:$0xff] %v536_v46  ;;  %v529_v52 = vadd.f32 %v521_v47, %v505_v42 }
  0x47   : > { %v482_v53 = vadd.f32 %v843_v26, %v443_v48  ;;  %v490_v54 = vmax.f32 %v458_v49, 0.0  ;;  %v498_v55 = vmax.f32 %v466_v50, 0.0 }
  0x48   : > { %v506_v56 = vmax.f32 %v474_v51, 0.0  ;;  %v537_v57 = vadd.f32 %v529_v52, %v513_v43 }
  0x49   : > { %v514_v58 = vmax.f32 %v482_v53, 0.0  ;;  %v522_v59 = vadd.f32 %v498_v55, %v490_v54 }
  0x4a   : > { %545 = vst [vmem:[%s875_s11 + $0x30] sm:$0xff] %v537_v57 }
  0x4b   : > { %v530_v60 = vadd.f32 %v522_v59, %v506_v56 }
  0x4d   : > { %v538_v16 = vadd.f32 %v530_v60, %v514_v58 }
  0x4f   : > { %546 = vst [vmem:[%s875_s11 + $0x38] sm:$0xff] %v538_v16 }
  0x50 PF: > { %p10_p9 = scmp.ge.s32.totalorder %s789_s16, 4   ;;  %s952_s12 = smov %s746_s13 }
  0x51   : > { %s953_s13 = smov %s798_s19  ;;  %s954_s14 = smov %s789_s16 }
  0x52   :  { %12 = sbr.rel (!%p10_p9) target bundleno = 2 (0x2), region = 108 }

</bundles_post_ra>
